<compile_context>
chip_gen: v5e
topology: v5e:2x2
jax: 0.10.0
libtpu: 0.0.40
codegen_flags: <defaults>
</compile_context>

<pallas_src>
import functools

import jax
import jax.numpy as jnp
from jax.experimental import pallas as pl
from jax.experimental.pallas import tpu as pltpu


# ------------------------------------------------------------------------------
# Kernels
# ------------------------------------------------------------------------------
def sage_layer1_kernel(a_ref, xb_ref, xr_ref, w1_ref, b1_ref, h_ref, hb_ref):
    """SAGEConv1 + ReLU for one row-tile of nodes.

    a_ref : (tm, N)       bf16   row-normalized adjacency tile
    xb_ref: (N, Fin_p)    bf16   full node features (VMEM resident)
    xr_ref: (tm, Fin_p)   f32    row-tile of node features (root term)
    w1_ref: (2*Fin_p, Fout_p) f32  fused [W_l; W_r]
    b1_ref: (1, Fout_p)   f32
    h_ref : (tm, Fout_p)  f32    ReLU output (row tile)
    hb_ref: (tm, Fout_p)  bf16   same, pre-cast for layer-2 aggregation
    """
    agg = jnp.dot(a_ref[...], xb_ref[...], preferred_element_type=jnp.float32)
    z = jnp.concatenate([agg, xr_ref[...]], axis=-1)          # (tm, 2*Fin_p)
    h = jnp.dot(z, w1_ref[...], preferred_element_type=jnp.float32) + b1_ref[...]
    h = jnp.maximum(h, 0.0)                                   # ReLU
    # F.dropout(p=0.6, training=False) -> identity in eval mode.
    h_ref[...] = h
    hb_ref[...] = h.astype(jnp.bfloat16)


def _sage_layer2_head_kernel(num_classes,
                             a_ref, hb_ref, hr_ref,
                             w2_ref, b2_ref, w3_ref, b3_ref,
                             out_ref):
    """SAGEConv2 + ReLU + Linear + masked log_softmax for one row-tile.

    out_ref: (tm, 128) f32 -- lane-dense output; only [:, :num_classes] is valid.
    """
    agg = jnp.dot(a_ref[...], hb_ref[...], preferred_element_type=jnp.float32)
    z = jnp.concatenate([agg, hr_ref[...]], axis=-1)          # (tm, 2*Fout_p)
    h = jnp.dot(z, w2_ref[...], preferred_element_type=jnp.float32) + b2_ref[...]
    h = jnp.maximum(h, 0.0)                                   # ReLU
    # dropout -> identity (eval)

    logits = jnp.dot(h, w3_ref[...], preferred_element_type=jnp.float32) + b3_ref[...]
    col = jax.lax.broadcasted_iota(jnp.int32, logits.shape, 1)
    valid = col < num_classes
    masked = jnp.where(valid, logits, -1e30)                  # kill padded lanes
    m = jnp.max(masked, axis=-1, keepdims=True)
    zc = masked - m
    lse = jnp.log(jnp.sum(jnp.exp(zc), axis=-1, keepdims=True))
    out_ref[...] = jnp.where(valid, zc - lse, 0.0)


# ------------------------------------------------------------------------------
# Wrapper
# ------------------------------------------------------------------------------
def _round_up(v, m):
    return ((v + m - 1) // m) * m


def _pad2(a, rows, cols):
    return jnp.pad(a, ((0, rows - a.shape[0]), (0, cols - a.shape[1])))


def _vmem_limit_bytes(n, tm, fin_p, fout_p):
    a_tiles = 2 * tm * n * 2                                  # double-buffered bf16 A tile
    resident = n * (fin_p + fout_p) * (2 + 4)                 # x / h1 (bf16 full + f32 rows)
    weights = (2 * fin_p * fout_p + 2 * fout_p * fout_p + fout_p * 128 + 256) * 4
    out_tiles = 2 * 2 * tm * max(fout_p, 128) * 4
    need = a_tiles + resident + weights + out_tiles
    return min(max(int(need * 1.5) + (8 << 20), 32 << 20), 40 << 20)


def graphsage_forward(adj, x, params, *, tm=64, num_classes=2):
    """adj: (N, N) f32 row-normalized adjacency, x: (N, in_feat) f32."""
    n, in_feat = x.shape
    out_feat = params["w1l"].shape[1]
    assert n % tm == 0 and tm % 8 == 0, "node row-tile must divide N and be 8-aligned"

    fin_p = _round_up(max(in_feat, 128), 128)
    fout_p = _round_up(max(out_feat, 128), 128)

    # --- pad + fuse parameters (zero padding keeps semantics exact) ---
    w1 = jnp.concatenate([_pad2(params["w1l"], fin_p, fout_p),
                          _pad2(params["w1r"], fin_p, fout_p)], axis=0)   # (2*Fin_p, Fout_p)
    b1 = _pad2(params["b1"], 1, fout_p)
    w2 = jnp.concatenate([_pad2(params["w2l"], fout_p, fout_p),
                          _pad2(params["w2r"], fout_p, fout_p)], axis=0)  # (2*Fout_p, Fout_p)
    b2 = _pad2(params["b2"], 1, fout_p)
    w3 = _pad2(params["w3"], fout_p, 128)                                 # (Fout_p, 128)
    b3 = _pad2(params["b3"], 1, 128)

    x_p = _pad2(x, n, fin_p)                  # f32 root-term features
    x_bf16 = x_p.astype(jnp.bfloat16)         # bf16 operand for A @ X
    adj_bf16 = adj.astype(jnp.bfloat16)       # dominant HBM traffic -> bf16

    grid = (n // tm,)
    cparams = pltpu.CompilerParams(
        dimension_semantics=("parallel",),
        vmem_limit_bytes=_vmem_limit_bytes(n, tm, fin_p, fout_p),
    )

    # ---------------- layer 1: SAGEConv1 + ReLU ----------------
    ce1 = pl.CostEstimate(
        flops=2 * n * n * fin_p + 2 * n * (2 * fin_p) * fout_p,
        transcendentals=0,
        bytes_accessed=n * n * 2 + n * fin_p * 6
        + (2 * fin_p * fout_p + fout_p) * 4 + n * fout_p * 6,
    )
    h1, h1_bf16 = pl.pallas_call(
        sage_layer1_kernel,
        out_shape=(jax.ShapeDtypeStruct((n, fout_p), jnp.float32),
                   jax.ShapeDtypeStruct((n, fout_p), jnp.bfloat16)),
        grid=grid,
        in_specs=[
            pl.BlockSpec((tm, n), lambda i: (i, 0)),            # A row-tile (pipelined)
            pl.BlockSpec((n, fin_p), lambda i: (0, 0)),         # x full (resident)
            pl.BlockSpec((tm, fin_p), lambda i: (i, 0)),        # x row-tile (root)
            pl.BlockSpec((2 * fin_p, fout_p), lambda i: (0, 0)),
            pl.BlockSpec((1, fout_p), lambda i: (0, 0)),
        ],
        out_specs=(pl.BlockSpec((tm, fout_p), lambda i: (i, 0)),
                   pl.BlockSpec((tm, fout_p), lambda i: (i, 0))),
        compiler_params=cparams,
        cost_estimate=ce1,
    )(adj_bf16, x_bf16, x_p, w1, b1)

    # ------- layer 2: SAGEConv2 + ReLU + Linear + log_softmax -------
    ce2 = pl.CostEstimate(
        flops=2 * n * n * fout_p + 2 * n * (2 * fout_p) * fout_p + 2 * n * fout_p * 128,
        transcendentals=n * 128,
        bytes_accessed=n * n * 2 + n * fout_p * 6
        + (2 * fout_p * fout_p + fout_p * 128) * 4 + n * 128 * 4,
    )
    out_p = pl.pallas_call(
        functools.partial(_sage_layer2_head_kernel, num_classes),
        out_shape=jax.ShapeDtypeStruct((n, 128), jnp.float32),
        grid=grid,
        in_specs=[
            pl.BlockSpec((tm, n), lambda i: (i, 0)),            # A row-tile (pipelined)
            pl.BlockSpec((n, fout_p), lambda i: (0, 0)),        # h1 full bf16 (resident)
            pl.BlockSpec((tm, fout_p), lambda i: (i, 0)),       # h1 row-tile f32 (root)
            pl.BlockSpec((2 * fout_p, fout_p), lambda i: (0, 0)),
            pl.BlockSpec((1, fout_p), lambda i: (0, 0)),
            pl.BlockSpec((fout_p, 128), lambda i: (0, 0)),
            pl.BlockSpec((1, 128), lambda i: (0, 0)),
        ],
        out_specs=pl.BlockSpec((tm, 128), lambda i: (i, 0)),    # lane-dense output
        compiler_params=cparams,
        cost_estimate=ce2,
    )(adj_bf16, h1_bf16, h1, w2, b2, w3, b3)

    return out_p[:, :num_classes]


# ------------------------------------------------------------------------------
# Parameter / input helpers + pure-JAX reference
# ------------------------------------------------------------------------------
def make_params(key, in_feat, out_feat):
    ks = jax.random.split(key, 9)

    def init(k, shape):
        fan_in = shape[0]
        return (jax.random.normal(k, shape, jnp.float32) / jnp.sqrt(fan_in)).astype(jnp.float32)

    return {
        "w1l": init(ks[0], (in_feat, out_feat)),
        "w1r": init(ks[1], (in_feat, out_feat)),
        "b1": 0.1 * jax.random.normal(ks[2], (1, out_feat), jnp.float32),
        "w2l": init(ks[3], (out_feat, out_feat)),
        "w2r": init(ks[4], (out_feat, out_feat)),
        "b2": 0.1 * jax.random.normal(ks[5], (1, out_feat), jnp.float32),
        "w3": init(ks[6], (out_feat, 2)),
        "b3": 0.1 * jax.random.normal(ks[7], (1, 2), jnp.float32),
    }


def edge_index_to_mean_adj(edge_index, num_nodes):
    # edge_index: [2, E]; row 0 = source, row 1 = target (PyG convention,
    # messages aggregated at the target node). Mean over incoming edges.
    src, dst = edge_index[0], edge_index[1]
    counts = jnp.zeros((num_nodes, num_nodes), jnp.float32).at[dst, src].add(1.0)
    deg = counts.sum(axis=1, keepdims=True)
    return counts / jnp.maximum(deg, 1.0)


def graphsage_reference(adj, x, params):
    """Pure-JAX reference with the same bf16 aggregation precision as the kernel."""
    a = adj.astype(jnp.bfloat16)
    agg1 = jnp.dot(a, x.astype(jnp.bfloat16), preferred_element_type=jnp.float32)
    h1 = jnp.maximum(agg1 @ params["w1l"] + x @ params["w1r"] + params["b1"], 0.0)
    agg2 = jnp.dot(a, h1.astype(jnp.bfloat16), preferred_element_type=jnp.float32)
    h2 = jnp.maximum(agg2 @ params["w2l"] + h1 @ params["w2r"] + params["b2"], 0.0)
    logits = h2 @ params["w3"] + params["b3"]
    return jax.nn.log_softmax(logits, axis=1)


# ------------------------------------------------------------------------------
# Main
# ------------------------------------------------------------------------------
if __name__ == "__main__":
    key = jax.random.PRNGKey(0)
    k_x, k_src, k_dst, k_params = jax.random.split(key, 4)

    num_nodes = 128     # row-tiled with tm=64 -> 2 grid steps
    in_feat = 16
    out_feat = 32
    num_edges = 512

    x = jax.random.normal(k_x, (num_nodes, in_feat), jnp.float32)
    src = jax.random.randint(k_src, (num_edges,), 0, num_nodes)
    dst = jax.random.randint(k_dst, (num_edges,), 0, num_nodes)
    edge_index = jnp.stack([src, dst])

    adj = edge_index_to_mean_adj(edge_index, num_nodes)
    params = make_params(k_params, in_feat, out_feat)

    out = graphsage_forward(adj, x, params, tm=64)
    jax.block_until_ready(out)

    assert out.shape == (num_nodes, 2)
    assert bool(jnp.all(jnp.isfinite(out)))
    # log_softmax rows must exponentiate-sum to 1
    assert bool(jnp.allclose(jnp.exp(out).sum(axis=1), 1.0, atol=1e-3))
    # parity with pure-JAX reference (loose tol: bf16 aggregation + MXU accumulation order)
    ref = graphsage_reference(adj, x, params)
    assert bool(jnp.allclose(out, ref, atol=2e-2, rtol=2e-2))

    print("KERNEL_OK")
</pallas_src>

<mosaic_0001>
module attributes {stable_mosaic.version = 11 : i64} {
  func.func @sage_layer1_kernel(%arg0: i32, %arg1: memref<64x128xbf16, #tpu.memory_space<vmem>>, %arg2: memref<128x128xbf16, #tpu.memory_space<vmem>>, %arg3: memref<64x128xf32, #tpu.memory_space<vmem>>, %arg4: memref<256x128xf32, #tpu.memory_space<vmem>>, %arg5: memref<1x128xf32, #tpu.memory_space<vmem>>, %arg6: memref<64x128xf32, #tpu.memory_space<vmem>>, %arg7: memref<64x128xbf16, #tpu.memory_space<vmem>>) attributes {dimension_semantics = [#tpu.dimension_semantics<parallel>], iteration_bounds = array<i64: 2>, scalar_prefetch = 0 : i64, scratch_operands = 0 : i64, tpu.core_type = #tpu.core_type<tc>, window_params = [{transform_indices = @transform_0, window_bounds = array<i64: 64, 128>}, {pipeline_mode = #tpu.pipeline_mode<synchronous>, transform_indices = @transform_1, window_bounds = array<i64: 128, 128>}, {transform_indices = @transform_2, window_bounds = array<i64: 64, 128>}, {pipeline_mode = #tpu.pipeline_mode<synchronous>, transform_indices = @transform_3, window_bounds = array<i64: 256, 128>}, {pipeline_mode = #tpu.pipeline_mode<synchronous>, transform_indices = @transform_4, window_bounds = array<i64: 1, 128>}, {transform_indices = @transform_5, window_bounds = array<i64: 64, 128>}, {transform_indices = @transform_6, window_bounds = array<i64: 64, 128>}]} {
    %c0 = arith.constant 0 : index
    %c0_0 = arith.constant 0 : index
    %0 = vector.load %arg1[%c0, %c0_0] : memref<64x128xbf16, #tpu.memory_space<vmem>>, vector<64x128xbf16>
    %c0_1 = arith.constant 0 : index
    %c0_2 = arith.constant 0 : index
    %1 = vector.load %arg2[%c0_1, %c0_2] : memref<128x128xbf16, #tpu.memory_space<vmem>>, vector<128x128xbf16>
    %cst = arith.constant dense<0.000000e+00> : vector<64x128xf32>
    %2 = tpu.matmul %0, %1, %cst {dimension_numbers = #tpu.dot_dimension_numbers<[1], [0], [0], [1], [0, 0, 1, 1], [], []>} : vector<64x128xbf16>, vector<128x128xbf16>, vector<64x128xf32> -> vector<64x128xf32>
    %c0_3 = arith.constant 0 : index
    %c0_4 = arith.constant 0 : index
    %3 = vector.load %arg3[%c0_3, %c0_4] : memref<64x128xf32, #tpu.memory_space<vmem>>, vector<64x128xf32>
    %4 = tpu.concatenate %2, %3 in 1 : vector<64x128xf32>, vector<64x128xf32> -> vector<64x256xf32>
    %c0_5 = arith.constant 0 : index
    %c0_6 = arith.constant 0 : index
    %5 = vector.load %arg4[%c0_5, %c0_6] : memref<256x128xf32, #tpu.memory_space<vmem>>, vector<256x128xf32>
    %cst_7 = arith.constant dense<0.000000e+00> : vector<64x128xf32>
    %6 = tpu.matmul %4, %5, %cst_7 {dimension_numbers = #tpu.dot_dimension_numbers<[1], [0], [0], [1], [0, 0, 1, 1], [], []>} : vector<64x256xf32>, vector<256x128xf32>, vector<64x128xf32> -> vector<64x128xf32>
    %c0_8 = arith.constant 0 : index
    %c0_9 = arith.constant 0 : index
    %7 = vector.load %arg5[%c0_8, %c0_9] : memref<1x128xf32, #tpu.memory_space<vmem>>, vector<1x128xf32>
    %8 = vector.broadcast %7 : vector<1x128xf32> to vector<64x128xf32>
    %9 = arith.addf %6, %8 : vector<64x128xf32>
    %cst_10 = arith.constant 0.000000e+00 : f32
    %10 = vector.broadcast %cst_10 : f32 to vector<64x128xf32>
    %11 = arith.maximumf %9, %10 : vector<64x128xf32>
    %c0_11 = arith.constant 0 : index
    %c0_12 = arith.constant 0 : index
    %12 = vector.load %arg6[%c0_11, %c0_12] : memref<64x128xf32, #tpu.memory_space<vmem>>, vector<64x128xf32>
    tpu.vector_store %arg6[%c0_11, %c0_12], %11 {strides = array<i32>} : memref<64x128xf32, #tpu.memory_space<vmem>>, vector<64x128xf32>,
    %13 = arith.truncf %11 : vector<64x128xf32> to vector<64x128xbf16>
    %c0_13 = arith.constant 0 : index
    %c0_14 = arith.constant 0 : index
    %14 = vector.load %arg7[%c0_13, %c0_14] : memref<64x128xbf16, #tpu.memory_space<vmem>>, vector<64x128xbf16>
    tpu.vector_store %arg7[%c0_13, %c0_14], %13 {strides = array<i32>} : memref<64x128xbf16, #tpu.memory_space<vmem>>, vector<64x128xbf16>,
    return
  }
  func.func @transform_0(%arg0: i32) -> (i32, i32) {
    %c0_i32 = arith.constant 0 : i32
    %c0_i32_0 = arith.constant 0 : i32
    return %arg0, %c0_i32 : i32, i32
  }
  func.func @transform_1(%arg0: i32) -> (i32, i32) {
    %c0_i32 = arith.constant 0 : i32
    %c0_i32_0 = arith.constant 0 : i32
    %c0_i32_1 = arith.constant 0 : i32
    return %c0_i32, %c0_i32_0 : i32, i32
  }
  func.func @transform_2(%arg0: i32) -> (i32, i32) {
    %c0_i32 = arith.constant 0 : i32
    %c0_i32_0 = arith.constant 0 : i32
    return %arg0, %c0_i32 : i32, i32
  }
  func.func @transform_3(%arg0: i32) -> (i32, i32) {
    %c0_i32 = arith.constant 0 : i32
    %c0_i32_0 = arith.constant 0 : i32
    %c0_i32_1 = arith.constant 0 : i32
    return %c0_i32, %c0_i32_0 : i32, i32
  }
  func.func @transform_4(%arg0: i32) -> (i32, i32) {
    %c0_i32 = arith.constant 0 : i32
    %c0_i32_0 = arith.constant 0 : i32
    %c0_i32_1 = arith.constant 0 : i32
    return %c0_i32, %c0_i32_0 : i32, i32
  }
  func.func @transform_5(%arg0: i32) -> (i32, i32) {
    %c0_i32 = arith.constant 0 : i32
    %c0_i32_0 = arith.constant 0 : i32
    return %arg0, %c0_i32 : i32, i32
  }
  func.func @transform_6(%arg0: i32) -> (i32, i32) {
    %c0_i32 = arith.constant 0 : i32
    %c0_i32_0 = arith.constant 0 : i32
    return %arg0, %c0_i32 : i32, i32
  }
}

</mosaic_0001>

<bundles_post_ra>
// kernel: tpu_custom_call.1
= control target key start
LH: loop header
LB: loop body
LE: loop exit
PB: predicated region body
PF: predicated region fallthrough
CT: control target
= control target key end

     0   :  { %s1584_s0 = inlined_call_operand.hbm [shape: bf16[128,128], index: 0, kind: input, shape index: {}]   ;;  %s1585_s1 = inlined_call_operand.hbm [shape: bf16[128,128], index: 1, kind: input, shape index: {}]   ;;  %s1586_s2 = inlined_call_operand.hbm [shape: f32[128,128], index: 2, kind: input, shape index: {}]   ;;  %s1587_s3 = inlined_call_operand.hbm [shape: f32[256,128], index: 3, kind: input, shape index: {}]   ;;  %s1588_s4 = inlined_call_operand.vmem [shape: f32[1,128], index: 4, kind: input, shape index: {}]   ;;  %s1589_s5 = inlined_call_operand.hbm [shape: f32[128,128], index: 5, kind: output, shape index: {0}]   ;;  %s1590_s6 = inlined_call_operand.hbm [shape: bf16[128,128], index: 6, kind: output, shape index: {1}]  }
   0x1   :  { %1597 = sst [smem:[#allocation21_spill]] %s1584_s0 }
   0x2   :  { %1598 = sst [smem:[#allocation22_spill]] %s1585_s1 }
   0x3   :  { %1599 = sst [smem:[#allocation23_spill]] %s1587_s3 }
   0x4   :  { %12 = vsyncpa [#allocation3], 0 }
   0x5   :  { %14 = vsyncpa [#allocation3 + $0x1], 0 }
   0x6   :  { %15 = vsyncpa [#allocation6], 0 }
   0x7   :  { %16 = vsyncpa [#allocation4], 0 }
   0x8   :  { %18 = vsyncpa [#allocation4 + $0x1], 0 }
   0x9   :  { %19 = vsyncpa [#allocation11], 0 }
   0xa   :  { %21 = vsyncpa [#allocation11 + $0x1], 0  ;;  %s1325_s21 = smov 0   ;;  %s1327_s22 = smov 0  }
   0xb   :  { %s1329_s23 = smov 0   ;;  %s1331_s24 = smov 0  }
   0xc LB: > { %1600 = sst [smem:[#allocation18_spill]] %s1274_s23  ;;  %s1346_s25 = sadd.s32 4294967295, %s1278_s24   ;;  %s1278_s24 = sphi %s1331_s24, %s1619_s24   ;;  %s1274_s23 = sphi %s1329_s23, %s1621_s23   ;;  %s1270_s22 = sphi %s1327_s22, %s1623_s22   ;;  %s1266_s21 = sphi %s1325_s21, %s1622_s21  }
   0xd   : > { %s825_s26 = sadd.s32 4294967294, %s1278_s24   ;;  %p47_p0 = scmp.ne.s32.totalorder %s1270_s22, %s1266_s21 }
   0xe   : > { %p1596_p1 = scmp.eq.s32.totalorder %s1346_s25, 0  ;;  %p160_p2 = scmp.eq.s32.totalorder %s1346_s25, 1 }
   0xf   : > { %p166_p3 = scmp.eq.s32.totalorder %s825_s26, 1  ;;  %p826_p5 = scmp.ge.s32.totalorder %s1278_s24, 1 }
  0x10   : > { %p1355_p4 = por %p1596_p1, %p47_p0  ;;  %p199_p7 = scmp.lt.s32.totalorder %s1278_s24, 3 }
  0x11   : > { %p1360_p6 = por %p166_p3, %p47_p0  ;;  %s1603_s1 = sld [smem:[#allocation22_spill]] }
  0x12   : > { %p1368_p8 = pnand %p826_p5, %p199_p7  ;;  %s1280_s9 = smov [#allocation5]  }
  0x13   : > { %s212_s10 = sshll.u32 %s1280_s9, 4  ;;  %s1382_s12 = sadd.s32 1, %s1278_s24   ;;  %s213_s10 = int_to_ptr.vmem [resolvable:$true] %s212_s10 }
  0x14   : > { %p978_p9 = pneg %p1368_p8  ;;  %1606 = sst [smem:[#allocation19_spill]] %s1382_s12 }
  0x15   : > { %s1591_s13 = smov 64   ;;  %s1592_s14 = smov 4  }
  0x16   : > { %p1376_p10 = pnand %p978_p9, %p1596_p1  ;;  %s31_s15 = ssub.s32 %s1278_s24, %s1382_s12 }
  0x17   : > { %s210_s7 = sshll.u32 %s1603_s1, 4  ;;  %s34_s16 = sadd.s32 1, %s1274_s23  ;;  %s211_s7 = int_to_ptr.hbm [resolvable:$true] %s210_s7 }
  0x18   : > { %981 = dma.hbm_to_vmem [thread:$0]  (!%p1376_p10), %s211_s7, 1024, %s213_s10, [#allocation6], %s1591_s13, %s1591_s13, %s1592_s14  }
  0x19   : > { %p32_p12 = scmp.eq.s32.totalorder %s31_s15, 0  ;;  %p41_p13 = scmp.ne.s32.totalorder %s1274_s23, %s1270_s22 }
  0x1a   : > { %p42_p0 = scmp.eq.s32.totalorder %s1278_s24, 0  ;;  %p1001_p3 = scmp.lt.s32.totalorder %s1278_s24, 2 }
  0x1b   : > { %s1397_s17 = scalar_select %p32_p12, %s1274_s23, %s34_s16  }
  0x1c   : > { %p43_p5 = por %p42_p0, %p41_p13  ;;  %p1401_p7 = por %p160_p2, %p41_p13 }
  0x1d   : > { %1607 = sst [smem:[#allocation20_spill]] %s1397_s17  ;;  %s243_s19 = sand.u32 1, %s1278_s24  }
  0x1e   : > { %s245_s20 = sand.u32 1, %s1274_s23   ;;  %s899_s29 = sshll.u32 %s1278_s24, 5 }
  0x1f   : > { %s830_s26 = sshll.u32 %s245_s20, 5  ;;  %s1609_s0 = sld [smem:[#allocation21_spill]] }
  0x20   : > { %s247_s10 = scalar_lea.vmem [#allocation2], %s830_s26  ;;  %p1413_p9 = pnand %p1001_p3, %p43_p5 }
  0x21   : > { %s255_s15 = sshll.u32 %s247_s10, 4  ;;  %s833_s14 = sshll.u32 %s245_s20, 6  ;;  %s256_s15 = int_to_ptr.vmem [resolvable:$true] %s255_s15 }
  0x22   : > { %s1611_s3 = sld [smem:[#allocation23_spill]]  ;;  %s1420_s12 = scalar_lea.sflag [#allocation3], %s243_s19 }
  0x23   : > { %p1082_p12 = pneg %p1413_p9 }
  0x25   : > { %s252_s9 = scalar_lea.hbm %s1609_s0, %s899_s29  ;;  %s1085_s20 = scalar_lea.hbm %s1609_s0, 64 }
  0x26   : > { %s253_s13 = sshll.u32 %s252_s9, 4  ;;  %s254_s13 = int_to_ptr.hbm [resolvable:$true] %s253_s13 }
  0x27   : > { %s1078_s29 = sshra.s32 %s254_s13, 4  ;;  %s1079_s29 = int_to_ptr.hbm [resolvable:$true] %s1078_s29 }
  0x28   : > { %s224_s23 = sshll.u32 %s1611_s3, 4  ;;  %s1080_s26 = scalar_lea.hbm %s1079_s29, 32  ;;  %s225_s23 = int_to_ptr.hbm [resolvable:$true] %s224_s23 }
  0x29   : > { %p1081_p2 = scmp.ne.s32.totalorder %s1079_s29, %s1080_s26  ;;  %p1086_p3 = scmp.lt.s32.totalorder %s1079_s29, %s1609_s0 }
  0x2a   : > { %p1087_p5 = scmp.lt.s32.totalorder %s1085_s20, %s1080_s26 }
  0x2b   : > { %p1083_p13 = pnand %p1082_p12, %p1081_p2 }
  0x2c   : > { %p1088_p11 = por %p1087_p5, %p1086_p3 }
  0x2d   : > { %p1084_p0 = pneg %p1083_p13 }
  0x2f   : > { %p1089_p1 = pnand %p1088_p11, %p1084_p0 }
  0x31   : > { %1092 = shalt.err (!%p1089_p1)
}
  0x32   : > { %s1612_s1 = smov 4   ;;  %s1613_s17 = smov 64  }
  0x33   : > { %988 = dma.hbm_to_vmem [thread:$0]  (!%p1413_p9), %s254_s13, 512, %s256_s15, %s1420_s12, %s1613_s17, %s1613_s17, %s1612_s1  }
  0x34   : > { %s269_s19 = scalar_lea.vmem [#allocation7], %s833_s14  ;;  %s1283_s29 = smov [#allocation8]  }
  0x35   : > { %s1439_s30 = sshll.u32 %s269_s19, 4  ;;  %s226_s26 = sshll.u32 %s1283_s29, 4  ;;  %s227_s26 = int_to_ptr.vmem [resolvable:$true] %s226_s26  ;;  %s278_s30 = int_to_ptr.vmem [resolvable:$true] %s1439_s30 }
  0x36   : > { %s900_s7 = sshll.u32 %s1278_s24, 6  ;;  %s1284_s20 = smov 128  }
  0x37   : > { %s1285_s9 = smov 8   ;;  %s274_s3 = scalar_lea.hbm %s1586_s2, %s900_s7 }
  0x38   : > { %984 = dma.hbm_to_vmem [thread:$0]  (!%p1376_p10), %s225_s23, 4096, %s227_s26, [#allocation6], %s1284_s20, %s1284_s20, %s1285_s9  }
  0x39   : > { %s275_s13 = sshll.u32 %s274_s3, 4  ;;  %s1145_s11 = scalar_lea.hbm %s1586_s2, 128  ;;  %s276_s13 = int_to_ptr.hbm [resolvable:$true] %s275_s13 }
  0x3a   : > { %s1138_s14 = sshra.s32 %s276_s13, 4  ;;  %s1139_s14 = int_to_ptr.hbm [resolvable:$true] %s1138_s14 }
  0x3b   : > { %s1140_s15 = scalar_lea.hbm %s1139_s14, 64  ;;  %p1146_p10 = scmp.lt.s32.totalorder %s1139_s14, %s1586_s2 }
  0x3c   : > { %p1141_p1 = scmp.ne.s32.totalorder %s1139_s14, %s1140_s15  ;;  %p1147_p13 = scmp.lt.s32.totalorder %s1145_s11, %s1140_s15 }
  0x3e   : > { %p1143_p11 = pnand %p1141_p1, %p1082_p12  ;;  %p1148_p0 = por %p1147_p13, %p1146_p10 }
  0x40   : > { %p1144_p2 = pneg %p1143_p11 }
  0x42   : > { %p1149_p3 = pnand %p1148_p0, %p1144_p2 }
  0x44   : > { %1152 = shalt.err (!%p1149_p3)
}
  0x45   : > { %991 = dma.hbm_to_vmem [thread:$0]  (!%p1413_p9), %s276_s13, 1024, %s278_s30, %s1420_s12, %s1284_s20, %s1284_s20, %s1285_s9  }
  0x46   : > { %289 = sbr.rel (%p1368_p8) target bundleno = 448 (0x1c0), region = 40  ;;  %s291_s0 = sand.u32 (!%p1368_p8), 1, %s1346_s25  }
  0x47   : > { %s1464_s3 = sand.u32 (!%p1368_p8), 1, %s1270_s22   ;;  %s292_s26 = scalar_lea.sflag (!%p1368_p8), [#allocation3], %s291_s0 }
  0x48   : > { %s837_s29 = sshll.u32 (!%p1368_p8), %s1464_s3, 5 }
  0x49   : > { %s1469_s7 = scalar_lea.vmem (!%p1368_p8), [#allocation2], %s837_s29 }
  0x4b   : > { %1241 = dma.done.wait (%p1355_p4), %s292_s26, 512  }
  0x4c   : > { %1243 = vsyncadd (%p1355_p4), %s292_s26, 4294966784  ;;  %p1614_p8 = scmp.eq.s32.totalorder %s1346_s25, 0 }
  0x4e   : > { %1245 = dma.done.wait (%p1614_p8), [#allocation6], 1024   ;;  %p1615_p9 = pmov %p1614_p8 }
  0x4f   : > { %s839_s8 = sshll.u32 %s1464_s3, 6 }
  0x50   : > { %1247 = vsyncadd (%p1615_p9), [#allocation6], 4294966272  ;;  %s1482_s12 = scalar_lea.vmem [#allocation7], %s839_s8 }
  0x51   : > { %1249 = dma.done.wait (%p1355_p4), %s292_s26, 1024  }
  0x52   : > { %1251 = vsyncadd (%p1355_p4), %s292_s26, 4294966272  ;;  %p1616_p12 = pmov %p1614_p8 }
  0x53   : > { %p1617_p5 = pmov %p1614_p8 }
  0x54   : > { %1253 = dma.done.wait (%p1616_p12), [#allocation6], 4096  }
  0x55   : > { %1255 = vsyncadd (%p1617_p5), [#allocation6], 4294963200  ;;  %v912_v0 = vld [vmem:[#allocation5 + $0x38] sm:$0xff]  ;;  %v911_v1 = vld [vmem:[#allocation5 + $0x30] sm:$0xff]  ;;  %s1509_s30 = scalar_lea.vmem [#allocation9], %s839_s8  ;;  %s1515_s20 = scalar_lea.vmem [#allocation10], %s837_s29 }
  0x56   : > { %455 = vmatpush.bf16.msra.mxu0 %v912_v0  ;;  %938 = vmatpush.bf16.msra.mxu3 %v912_v0  ;;  %v910_v2 = vld [vmem:[#allocation5 + $0x28] sm:$0xff]  ;;  %v909_v3 = vld [vmem:[#allocation5 + $0x20] sm:$0xff]  ;;  %v908_v4 = vld [vmem:[#allocation5 + $0x18] sm:$0xff]  ;;  %s913_s9 = sshll.u32 %s1346_s25, 6  ;;  %s914_s10 = sshll.u32 %s1346_s25, 5 }
  0x57   : > { %v907_v5 = vld [vmem:[#allocation5 + $0x10] sm:$0xff]  ;;  %v906_v6 = vld [vmem:[#allocation5 + $0x8] sm:$0xff]  ;;  %v905_v7 = vld [vmem:[#allocation5] sm:$0xff]  ;;  %s659_s15 = scalar_lea.hbm %s1589_s5, %s913_s9  ;;  %s660_s1 = sshll.u32 %s1509_s30, 4  ;;  %s661_s1 = int_to_ptr.vmem [resolvable:$true] %s660_s1 }
  0x58   : > { %v901_v8 = vld [vmem:[%s1469_s7] sm:$0xff]  ;;  %v902_v9 = vld [vmem:[%s1469_s7 + $0x8] sm:$0xff]  ;;  %v523_v10 = vld [vmem:[#allocation8 + $0xf8] sm:$0xff]  ;;  %s677_s17 = sshll.u32 %s1515_s20, 4  ;;  %s676_s19 = scalar_lea.hbm %s1590_s6, %s914_s10  ;;  %s1535_s17 = int_to_ptr.vmem [resolvable:$true] %s677_s17 }
  0x59   : > { %v522_v11 = vld [vmem:[#allocation8 + $0xf0] sm:$0xff]  ;;  %v507_v12 = vld [vmem:[#allocation8 + $0x78] sm:$0xff]  ;;  %569 = vmatpush.msra.mxu2 %v523_v10  ;;  %v521_v14 = vld [vmem:[#allocation8 + $0xe8] sm:$0xff]  ;;  %s662_s0 = sshll.u32 %s659_s15, 4  ;;  %s679_s25 = sshll.u32 %s676_s19, 4  ;;  %s663_s0 = int_to_ptr.hbm [resolvable:$true] %s662_s0  ;;  %s1537_s25 = int_to_ptr.hbm [resolvable:$true] %s679_s25 }
  0x5a   : > { %456 = vmatpush.bf16.msra.mxu0 %v911_v1  ;;  %939 = vmatpush.bf16.msra.mxu3 %v911_v1  ;;  %v506_v13 = vld [vmem:[#allocation8 + $0x70] sm:$0xff]  ;;  %v505_v15 = vld [vmem:[#allocation8 + $0x68] sm:$0xff]  ;;  %v520_v16 = vld [vmem:[#allocation8 + $0xe0] sm:$0xff]  ;;  %s643_s29 = scalar_lea.sflag [#allocation4], %s1464_s3  ;;  %s1182_s26 = sshra.s32 %s663_s0, 4  ;;  %s1183_s26 = int_to_ptr.hbm [resolvable:$true] %s1182_s26 }
  0x5b   : > { %946 = vmatpush.msra.mxu1 %v507_v12  ;;  %570 = vmatpush.msra.mxu2 %v522_v11  ;;  %v504_v17 = vld [vmem:[#allocation8 + $0x60] sm:$0xff]  ;;  %v519_v18 = vld [vmem:[#allocation8 + $0xd8] sm:$0xff]  ;;  %v518_v20 = vld [vmem:[#allocation8 + $0xd0] sm:$0xff]  ;;  %s1188_s27 = scalar_lea.hbm %s1589_s5, 128  ;;  %p1189_p2 = scmp.lt.s32.totalorder %s1183_s26, %s1589_s5 }
  0x5c   : > { %v503_v19 = vld [vmem:[#allocation8 + $0x58] sm:$0xff]  ;;  %v502_v21 = vld [vmem:[#allocation8 + $0x50] sm:$0xff]  ;;  %v517_v22 = vld [vmem:[#allocation8 + $0xc8] sm:$0xff] }
  0x5d   : > { %947 = vmatpush.msra.mxu1 %v506_v13  ;;  %571 = vmatpush.msra.mxu2 %v521_v14  ;;  %v501_v23 = vld [vmem:[#allocation8 + $0x48] sm:$0xff]  ;;  %v903_v24 = vld [vmem:[%s1469_s7 + $0x10] sm:$0xff]  ;;  %v516_v25 = vld [vmem:[#allocation8 + $0xc0] sm:$0xff] }
  0x5e   : > { %457 = vmatpush.bf16.msra.mxu0 %v910_v2  ;;  %940 = vmatpush.bf16.msra.mxu3 %v910_v2  ;;  %v500_v26 = vld [vmem:[#allocation8 + $0x40] sm:$0xff]  ;;  %v515_v27 = vld [vmem:[#allocation8 + $0xb8] sm:$0xff]  ;;  %v514_v29 = vld [vmem:[#allocation8 + $0xb0] sm:$0xff] }
  0x5f   : > { %948 = vmatpush.msra.mxu1 %v505_v15  ;;  %572 = vmatpush.msra.mxu2 %v520_v16  ;;  %v499_v28 = vld [vmem:[#allocation8 + $0x38] sm:$0xff]  ;;  %v498_v30 = vld [vmem:[#allocation8 + $0x30] sm:$0xff]  ;;  %v513_v31 = vld [vmem:[#allocation8 + $0xa8] sm:$0xff] }
  0x60   : > { %v497_v32 = vld [vmem:[#allocation8 + $0x28] sm:$0xff]  ;;  %v512_v33 = vld [vmem:[#allocation8 + $0xa0] sm:$0xff]  ;;  %v511_v35 = vld [vmem:[#allocation8 + $0x98] sm:$0xff] }
  0x61   : > { %949 = vmatpush.msra.mxu1 %v504_v17  ;;  %573 = vmatpush.msra.mxu2 %v519_v18  ;;  %v496_v34 = vld [vmem:[#allocation8 + $0x20] sm:$0xff]  ;;  %v495_v36 = vld [vmem:[#allocation8 + $0x18] sm:$0xff]  ;;  %v510_v37 = vld [vmem:[#allocation8 + $0x90] sm:$0xff] }
  0x62   : > { %458 = vmatpush.bf16.msra.mxu0 %v909_v3  ;;  %941 = vmatpush.bf16.msra.mxu3 %v909_v3  ;;  %v494_v38 = vld [vmem:[#allocation8 + $0x10] sm:$0xff]  ;;  %v509_v39 = vld [vmem:[#allocation8 + $0x88] sm:$0xff]  ;;  %v904_v41 = vld [vmem:[%s1469_s7 + $0x18] sm:$0xff]  ;;  %s1184_s7 = scalar_lea.hbm %s1183_s26, 64 }
  0x63   : > { %950 = vmatpush.msra.mxu1 %v503_v19  ;;  %574 = vmatpush.msra.mxu2 %v518_v20  ;;  %v493_v40 = vld [vmem:[#allocation8 + $0x8] sm:$0xff]  ;;  %v508_v42 = vld [vmem:[#allocation8 + $0x80] sm:$0xff]  ;;  %v486_v46 = vld [vmem:[%s1482_s12 + $0x10] sm:$0xff]  ;;  %p1185_p4 = scmp.ne.s32.totalorder %s1183_s26, %s1184_s7  ;;  %p1190_p10 = scmp.lt.s32.totalorder %s1188_s27, %s1184_s7 }
  0x64   : > { %v484_v43 = vld [vmem:[%s1482_s12] sm:$0xff]  ;;  %v485_v45 = vld [vmem:[%s1482_s12 + $0x8] sm:$0xff]  ;;  %v487_v47 = vld [vmem:[%s1482_s12 + $0x18] sm:$0xff] }
  0x65   : > { %951 = vmatpush.msra.mxu1 %v502_v21  ;;  %575 = vmatpush.msra.mxu2 %v517_v22  ;;  %v492_v44 = vld [vmem:[#allocation8] sm:$0xff]  ;;  %v489_v50 = vld [vmem:[%s1482_s12 + $0x28] sm:$0xff]  ;;  %v490_v53 = vld [vmem:[%s1482_s12 + $0x30] sm:$0xff]  ;;  %p1186_p1 = pnand %p1185_p4, %p1401_p7  ;;  %p1191_p13 = por %p1190_p10, %p1189_p2 }
  0x66   : > { %459 = vmatpush.bf16.msra.mxu0 %v908_v4  ;;  %942 = vmatpush.bf16.msra.mxu3 %v908_v4  ;;  %v488_v48 = vld [vmem:[%s1482_s12 + $0x20] sm:$0xff]  ;;  %v491_v55 = vld [vmem:[%s1482_s12 + $0x38] sm:$0xff] }
  0x67   : > { %952 = vmatpush.msra.mxu1 %v501_v23  ;;  %576 = vmatpush.msra.mxu2 %v516_v25  ;;  %v1047_v62 = vld [vmem:[%s1588_s4] ss:$0 sm:$0xff]  ;;  %p1187_p11 = pneg %p1186_p1 }
  0x69   : > { %953 = vmatpush.msra.mxu1 %v500_v26  ;;  %577 = vmatpush.msra.mxu2 %v515_v27  ;;  %p1192_p0 = pnand %p1191_p13, %p1187_p11 }
  0x6a   : > { %460 = vmatpush.bf16.msra.mxu0 %v907_v5  ;;  %943 = vmatpush.bf16.msra.mxu3 %v907_v5 }
  0x6b   : > { %954 = vmatpush.msra.mxu1 %v499_v28  ;;  %578 = vmatpush.msra.mxu2 %v514_v29 }
  0x6d   : > { %955 = vmatpush.msra.mxu1 %v498_v30  ;;  %579 = vmatpush.msra.mxu2 %v513_v31 }
  0x6e   : > { %461 = vmatpush.bf16.msra.mxu0 %v906_v6  ;;  %944 = vmatpush.bf16.msra.mxu3 %v906_v6 }
  0x6f   : > { %956 = vmatpush.msra.mxu1 %v497_v32  ;;  %580 = vmatpush.msra.mxu2 %v512_v33 }
  0x71   : > { %957 = vmatpush.msra.mxu1 %v496_v34  ;;  %581 = vmatpush.msra.mxu2 %v511_v35 }
  0x72   : > { %462 = vmatpush.bf16.msra.mxu0 %v905_v7  ;;  %945 = vmatpush.bf16.msra.mxu3 %v905_v7 }
  0x73   : > { %958 = vmatpush.msra.mxu1 %v495_v36  ;;  %582 = vmatpush.msra.mxu2 %v510_v37 }
  0x75   : > { %463 = vmatmul.bf16.vlgmr.msra.gmra.mxu0 %v901_v8  ;;  %468 = vmatmul.bf16.vlgmr.msra.gmra.mxu3 %v902_v9 }
  0x76   : > { %528 = vmatpush.msrb.mxu0 %v507_v12  ;;  %959 = vmatpush.msra.mxu1 %v494_v38 }
  0x77   : > { %583 = vmatpush.msra.mxu2 %v509_v39 }
  0x78   : > { %529 = vmatpush.msrb.mxu0 %v506_v13  ;;  %960 = vmatpush.msra.mxu1 %v493_v40 }
  0x79   : > { %584 = vmatpush.msra.mxu2 %v508_v42 }
  0x7a   : > { %530 = vmatpush.msrb.mxu0 %v505_v15  ;;  %585 = vmatmul.f32.vlgmr.msra.gmra.mxu2 %v484_v43 }
  0x7b   : > { %961 = vmatpush.msra.mxu1 %v492_v44 }
  0x7c   : > { %531 = vmatpush.msrb.mxu0 %v504_v17 }
  0x7e   : > { %532 = vmatpush.msrb.mxu0 %v503_v19 }
  0x80   : > { %533 = vmatpush.msrb.mxu0 %v502_v21 }
  0x82   : > { %534 = vmatpush.msrb.mxu0 %v501_v23  ;;  %588 = vmatmul.f32.gmra.mxu2 %v485_v45 }
  0x84   : > { %535 = vmatpush.msrb.mxu0 %v500_v26 }
  0x85   : > { %473 = vmatmul.bf16.gmra.mxu3 %v903_v24 }
  0x86   : > { %536 = vmatpush.msrb.mxu0 %v499_v28 }
  0x88   : > { %537 = vmatpush.msrb.mxu0 %v498_v30 }
  0x8a   : > { %538 = vmatpush.msrb.mxu0 %v497_v32  ;;  %591 = vmatmul.f32.gmra.mxu2 %v486_v46 }
  0x8c   : > { %539 = vmatpush.msrb.mxu0 %v496_v34 }
  0x8e   : > { %540 = vmatpush.msrb.mxu0 %v495_v36 }
  0x90   : > { %541 = vmatpush.msrb.mxu0 %v494_v38 }
  0x92   : > { %542 = vmatpush.msrb.mxu0 %v493_v40  ;;  %594 = vmatmul.f32.gmra.mxu2 %v487_v47 }
  0x94   : > { %543 = vmatpush.msrb.mxu0 %v492_v44 }
  0x95   : > { %478 = vmatmul.bf16.gmra.mxu3 %v904_v41 }
  0x9a   : > { %597 = vmatmul.f32.gmra.mxu2 %v488_v48 }
  0xa2   : > { %600 = vmatmul.f32.gmra.mxu2 %v489_v50 }
  0xaa   : > { %603 = vmatmul.f32.gmra.mxu2 %v490_v53 }
  0xb2   : > { %606 = vmatmul.f32.gmra.mxu2 %v491_v55 }
  0xf2   : > { %v464_v49 = vpop.f32.mrf.mxu0 }
  0xf3   : > { %544 = vmatmul.f32.vlgmr.msrb.gmra.mxu0 %v464_v49 }
  0xf8   : > { %v469_v51 = vpop.f32.mrf.mxu3 }
  0xfa   : > { %v466_v52 = vpop.f32.mrf.mxu0 }
  0xfb   : > { %547 = vmatmul.f32.vlgmr.msra.gmra.mxu1 %v466_v52 }
  0xfd   : > { %v586_v60 = vpop.f32.mrf.mxu2 }
 0x100   : > { %v471_v54 = vpop.f32.mrf.mxu3 }
 0x103   : > { %550 = vmatmul.f32.gmra.mxu1 %v469_v51 }
 0x105   : > { %v589_v61 = vpop.f32.mrf.mxu2 }
 0x108   : > { %v474_v56 = vpop.f32.mrf.mxu3 }
 0x10b   : > { %553 = vmatmul.f32.gmra.mxu1 %v471_v54 }
 0x10d   : > { %v592_v3 = vpop.f32.mrf.mxu2 }
 0x110   : > { %v476_v57 = vpop.f32.mrf.mxu3 }
 0x113   : > { %556 = vmatmul.f32.gmra.mxu1 %v474_v56 }
 0x115   : > { %v595_v10 = vpop.f32.mrf.mxu2 }
 0x118   : > { %v479_v58 = vpop.f32.mrf.mxu3 }
 0x11b   : > { %559 = vmatmul.f32.gmra.mxu1 %v476_v57 }
 0x11d   : > { %v598_v16 = vpop.f32.mrf.mxu2 }
 0x120   : > { %v481_v59 = vpop.f32.mrf.mxu3 }
 0x123   : > { %562 = vmatmul.f32.gmra.mxu1 %v479_v58 }
 0x125   : > { %v601_v23 = vpop.f32.mrf.mxu2 }
 0x12b   : > { %565 = vmatmul.f32.gmra.mxu1 %v481_v59 }
 0x12d   : > { %v604_v29 = vpop.f32.mrf.mxu2 }
 0x135   : > { %v607_v36 = vpop.f32.mrf.mxu2 }
 0x170   : > { %v545_v63 = vpop.f32.mrf.mxu0 }
 0x171   : > { %v546_v0 = vadd.f32 %v1047_v62, %v545_v63 }
 0x173   : > { %v587_v1 = vadd.f32 %v586_v60, %v546_v0 }
 0x175   : > { %v610_v2 = vmax.f32 %v587_v1, 0.0 }
 0x177   : > { %618 = vst [vmem:[%s1509_s30] sm:$0xff] %v610_v2 }
 0x178   : > { %v548_v4 = vpop.f32.mrf.mxu1 }
 0x179   : > { %v549_v5 = vadd.f32 %v1047_v62, %v548_v4 }
 0x17b   : > { %v590_v6 = vadd.f32 %v589_v61, %v549_v5 }
 0x17d   : > { %v611_v7 = vmax.f32 %v590_v6, 0.0 }
 0x17f   : > { %619 = vst [vmem:[%s1509_s30 + $0x8] sm:$0xff] %v611_v7  ;;  %v918_v8 = vpack.c.bf16 %v611_v7, %v610_v2 }
 0x180   : > { %v551_v9 = vpop.f32.mrf.mxu1 }
 0x181   : > { %919 = vst [vmem:[%s1515_s20] sm:$0xff] %v918_v8   ;;  %v552_v11 = vadd.f32 %v1047_v62, %v551_v9 }
 0x183   : > { %v593_v12 = vadd.f32 %v592_v3, %v552_v11 }
 0x185   : > { %v612_v13 = vmax.f32 %v593_v12, 0.0 }
 0x187   : > { %620 = vst [vmem:[%s1509_s30 + $0x10] sm:$0xff] %v612_v13 }
 0x188   : > { %v554_v14 = vpop.f32.mrf.mxu1 }
 0x189   : > { %v555_v15 = vadd.f32 %v1047_v62, %v554_v14 }
 0x18b   : > { %v596_v17 = vadd.f32 %v595_v10, %v555_v15 }
 0x18d   : > { %v613_v18 = vmax.f32 %v596_v17, 0.0 }
 0x18f   : > { %621 = vst [vmem:[%s1509_s30 + $0x18] sm:$0xff] %v613_v18  ;;  %v923_v19 = vpack.c.bf16 %v613_v18, %v612_v13 }
 0x190   : > { %v557_v20 = vpop.f32.mrf.mxu1 }
 0x191   : > { %935 = vst [vmem:[%s1515_s20 + $0x8] sm:$0xff] %v923_v19   ;;  %v558_v21 = vadd.f32 %v1047_v62, %v557_v20 }
 0x193   : > { %v599_v22 = vadd.f32 %v598_v16, %v558_v21 }
 0x195   : > { %v614_v24 = vmax.f32 %v599_v22, 0.0 }
 0x197   : > { %622 = vst [vmem:[%s1509_s30 + $0x20] sm:$0xff] %v614_v24 }
 0x198   : > { %v560_v25 = vpop.f32.mrf.mxu1 }
 0x199   : > { %v561_v26 = vadd.f32 %v1047_v62, %v560_v25 }
 0x19b   : > { %v602_v27 = vadd.f32 %v601_v23, %v561_v26 }
 0x19d   : > { %v615_v28 = vmax.f32 %v602_v27, 0.0 }
 0x19f   : > { %623 = vst [vmem:[%s1509_s30 + $0x28] sm:$0xff] %v615_v28  ;;  %v928_v30 = vpack.c.bf16 %v615_v28, %v614_v24 }
 0x1a0   : > { %v563_v31 = vpop.f32.mrf.mxu1 }
 0x1a1   : > { %936 = vst [vmem:[%s1515_s20 + $0x10] sm:$0xff] %v928_v30   ;;  %v564_v32 = vadd.f32 %v1047_v62, %v563_v31 }
 0x1a3   : > { %v605_v33 = vadd.f32 %v604_v29, %v564_v32 }
 0x1a5   : > { %v616_v34 = vmax.f32 %v605_v33, 0.0 }
 0x1a7   : > { %624 = vst [vmem:[%s1509_s30 + $0x30] sm:$0xff] %v616_v34 }
 0x1a8   : > { %v566_v35 = vpop.f32.mrf.mxu1 }
 0x1a9   : > { %v567_v37 = vadd.f32 %v1047_v62, %v566_v35 }
 0x1ab   : > { %v608_v38 = vadd.f32 %v607_v36, %v567_v37 }
 0x1ad   : > { %v617_v39 = vmax.f32 %v608_v38, 0.0 }
 0x1af   : > { %625 = vst [vmem:[%s1509_s30 + $0x38] sm:$0xff] %v617_v39  ;;  %v933_v40 = vpack.c.bf16 %v617_v39, %v616_v34 }
 0x1b0   : > { %1195 = shalt.err (!%p1192_p0)
}
 0x1b1   : > { %s1286_s30 = smov 128   ;;  %s1287_s10 = smov 8   ;;  %937 = vst [vmem:[%s1515_s20 + $0x18] sm:$0xff] %v933_v40  }
 0x1b2   : > { %974 = dma.vmem_to_hbm [thread:$0]  (%p1401_p7), %s661_s1, 1024, %s663_s0, %s643_s29, %s1286_s30, %s1286_s30, %s1287_s10  }
 0x1b3   : > { %s648_s13 = scalar_lea.sflag [#allocation11], %s1464_s3  ;;  %s1210_s14 = sshra.s32 %s1537_s25, 4  ;;  %s1211_s14 = int_to_ptr.hbm [resolvable:$true] %s1210_s14 }
 0x1b4   : > { %s1212_s15 = scalar_lea.hbm %s1211_s14, 32  ;;  %s1216_s19 = scalar_lea.hbm %s1590_s6, 64 }
 0x1b5   : > { %p1213_p3 = scmp.ne.s32.totalorder %s1211_s14, %s1212_s15  ;;  %p1217_p12 = scmp.lt.s32.totalorder %s1211_s14, %s1590_s6 }
 0x1b6   : > { %p1218_p5 = scmp.lt.s32.totalorder %s1216_s19, %s1212_s15 }
 0x1b7   : > { %p1214_p8 = pnand %p1213_p3, %p1401_p7 }
 0x1b8   : > { %p1219_p4 = por %p1218_p5, %p1217_p12 }
 0x1b9   : > { %p1215_p9 = pneg %p1214_p8 }
 0x1bb   : > { %p1220_p1 = pnand %p1219_p4, %p1215_p9 }
 0x1bd   : > { %1223 = shalt.err (!%p1220_p1)
}
 0x1be   : > { %s1288_s3 = smov 64   ;;  %s1289_s20 = smov 4  }
 0x1bf   : > { %975 = dma.vmem_to_hbm [thread:$0]  (%p1401_p7), %s1535_s17, 512, %s1537_s25, %s648_s13, %s1288_s3, %s1288_s3, %s1289_s20  }
 0x1c0 PF: > { %s694_s1 = sand.u32 1, %s1266_s21   ;;  %p1618_p11 = scmp.ge.s32.totalorder %s1278_s24, 2 }
 0x1c1   : > { %s695_s0 = scalar_lea.sflag [#allocation4], %s694_s1 }
 0x1c2   : > { %p993_p2 = pnand %p1618_p11, %p1360_p6 }
 0x1c4   : > { %p994_p10 = pneg %p993_p2 }
 0x1c6   : > { %1257 = dma.done.wait (%p994_p10), %s695_s0, 1024  }
 0x1c7   : > { %1259 = vsyncadd (%p994_p10), %s695_s0, 4294966272  ;;  %s705_s29 = scalar_lea.sflag [#allocation11], %s694_s1 }
 0x1c8   : > { %1261 = dma.done.wait (%p994_p10), %s705_s29, 512  }
 0x1c9   : > { %1263 = vsyncadd (%p994_p10), %s705_s29, 4294966784  ;;  %s1619_s24 = sld [smem:[#allocation19_spill]]  ;;  %s1622_s21 = smov %s1270_s22 }
 0x1ca   : > { %s1620_s8 = sld [smem:[#allocation18_spill]] }
 0x1cb   : > { %s1621_s23 = sld [smem:[#allocation20_spill]] }
 0x1cf   : > { %p24_p7 = scmp.ge.s32.totalorder %s1619_s24, 4  }
 0x1d0   : > { %s1623_s22 = smov %s1620_s8 }
 0x1d1   :  { %26 = sbr.rel (!%p24_p7) target bundleno = 12 (0xc), region = 121 }
 0x1d6   :  { %711 = vsyncpa [#allocation3], 1 }
 0x1d7   :  { %713 = vsyncpa [#allocation3 + $0x1], 1 }
 0x1d8   :  { %714 = vsyncpa [#allocation6], 1 }
 0x1d9   :  { %715 = vsyncpa [#allocation4], 1 }
 0x1da   :  { %717 = vsyncpa [#allocation4 + $0x1], 1 }
 0x1db   :  { %718 = vsyncpa [#allocation11], 1 }
 0x1dc   :  { %720 = vsyncpa [#allocation11 + $0x1], 1 }

</bundles_post_ra>
